<compile_context>
chip_gen: v5e
topology: v5e:2x2
jax: 0.10.0
libtpu: 0.0.40
codegen_flags: <defaults>
</compile_context>

<pallas_src>
import jax
import jax.numpy as jnp
from jax.experimental import pallas as pl
from jax.experimental.pallas import tpu as pltpu


def _avg_consensus_kernel(x_ref, o_ref):
    # x_ref: (bt, T, tc) VMEM tile; o_ref: (bt, tc) VMEM tile (lane-dense).
    inv_t = 1.0 / float(x_ref.shape[1])
    s = jnp.sum(x_ref[...].astype(jnp.float32), axis=1)
    o_ref[...] = (s * inv_t).astype(o_ref.dtype)


def _sublane_multiple(itemsize):
    # Native sublane packing: 8 rows for 32-bit, 16 for 16-bit, 32 for 8-bit.
    return {4: 8, 2: 16, 1: 32}.get(itemsize, 8)


def _pick_tiles(B, T, C, itemsize):
    """Pick (bt, tc) batch/class tile sizes.

    Invariants:
      * input tile bt*T*tc*itemsize stays <= ~6 MiB (2x double-buffered input
        plus output buffers is well inside every generation's scoped VMEM once
        vmem_limit_bytes is set from the tile sizes),
      * bt is a multiple of the dtype's sublane packing or equals B,
      * tc is a multiple of 128 or equals C,
      * on large inputs the batch grid has >=2 steps (v7x megacore).
    """
    sub = _sublane_multiple(itemsize)
    target = 2 << 20   # amortize ~0.35 us/step grid overhead
    cap = 6 << 20      # single input tile cap

    row = T * C * itemsize  # one batch row at full C

    # Case 1: the whole input fits in one tile.
    if B * row <= cap:
        bt = B
        # v7x has 2 TensorCores: split the batch axis when it's worth it.
        if B * row >= (4 << 20):
            half = -(-B // 2)
            half_up = -(-half // sub) * sub
            if half_up < B:
                bt = half_up
        return bt, C

    # Case 2: tile the batch axis at full C with sublane-aligned bt.
    if sub * row <= cap:
        limit = (cap // row) // sub * sub          # aligned cap, >= sub
        want = -(-target // row)                   # rows to reach ~2 MiB
        bt = min(limit, max(sub, (want // sub) * sub))
        return min(bt, B), C

    # Case 3: a single aligned batch tile at full C is too big -> tile C too.
    bt = min(B, sub)
    if C <= 128:
        return bt, C
    tc = max(128, (cap // (bt * T * itemsize)) // 128 * 128)
    tc = min(tc, C)
    if tc != C:
        tc = max(128, (tc // 128) * 128)           # multiple of 128 (last block partial)
    return bt, tc


def consensus_module(x, consensus_type="avg", dim=1, *, min_pallas_bytes=512 << 10):
    """JAX/Pallas equivalent of ConsensusModule.forward (dim=1 only)."""
    assert dim == 1, "only dim=1 (segment axis) is supported"
    if consensus_type == "rnn":
        consensus_type = "identity"

    if consensus_type == "identity":
        # Pure no-op: returning x avoids an HBM->VMEM->HBM round-trip.
        return x

    if consensus_type != "avg":
        # PyTorch module returns None for unknown consensus types.
        return None

    B, T, C = x.shape
    itemsize = jnp.dtype(x.dtype).itemsize
    total_bytes = B * T * C * itemsize

    # Small-input bypass: realistic ConsensusModule shapes are tens of KiB;
    # a fused XLA reduce beats custom-call dispatch + pallas boundary.
    if total_bytes < min_pallas_bytes:
        return jnp.mean(x, axis=1, keepdims=True)

    bt, tc = _pick_tiles(B, T, C, itemsize)
    grid = (pl.cdiv(B, bt), pl.cdiv(C, tc))

    in_tile_bytes = bt * T * tc * itemsize
    out_tile_bytes = bt * tc * itemsize
    vmem_limit = int(2 * (in_tile_bytes + out_tile_bytes) + (2 << 20))

    cost = pl.CostEstimate(
        flops=B * T * C,
        transcendentals=0,
        bytes_accessed=total_bytes + B * C * itemsize,
    )

    out2d = pl.pallas_call(
        _avg_consensus_kernel,
        out_shape=jax.ShapeDtypeStruct((B, C), x.dtype),
        grid=grid,
        in_specs=[pl.BlockSpec((bt, T, tc), lambda b, c: (b, 0, c))],
        out_specs=pl.BlockSpec((bt, tc), lambda b, c: (b, c)),
        compiler_params=pltpu.CompilerParams(
            dimension_semantics=("parallel", "parallel"),
            vmem_limit_bytes=vmem_limit,
        ),
        cost_estimate=cost,
    )(x)
    # Restore keepdim=True semantics of torch.mean(dim=1, keepdim=True).
    return out2d.reshape(B, 1, C)


if __name__ == "__main__":
    key = jax.random.PRNGKey(0)

    # --- small canonical shape, force the Pallas path for coverage ---
    B, T, C = 2, 8, 32  # batch, num_segments, num_classes
    x = jax.random.normal(key, (B, T, C), dtype=jnp.float32)

    out_avg = jax.block_until_ready(
        consensus_module(x, consensus_type="avg", dim=1, min_pallas_bytes=0)
    )
    ref_avg = jnp.mean(x, axis=1, keepdims=True)
    assert out_avg.shape == (B, 1, C)
    assert jnp.allclose(out_avg, ref_avg, atol=1e-5, rtol=1e-5)

    # Same shape through the default small-input bypass (must match too).
    out_bypass = jax.block_until_ready(consensus_module(x, consensus_type="avg", dim=1))
    assert jnp.allclose(out_bypass, ref_avg, atol=1e-5, rtol=1e-5)

    # 'identity' consensus (also covers 'rnn') -> no data movement.
    out_id = jax.block_until_ready(consensus_module(x, consensus_type="identity", dim=1))
    assert out_id.shape == (B, T, C)
    assert jnp.allclose(out_id, x)
    out_rnn = jax.block_until_ready(consensus_module(x, consensus_type="rnn", dim=1))
    assert jnp.allclose(out_rnn, x)

    # --- awkward class count (UCF101-like C=101), Pallas path ---
    B2, T2, C2 = 16, 12, 101
    x2 = jax.random.normal(jax.random.PRNGKey(1), (B2, T2, C2), dtype=jnp.float32)
    out2 = jax.block_until_ready(
        consensus_module(x2, consensus_type="avg", dim=1, min_pallas_bytes=0)
    )
    ref2 = jnp.mean(x2, axis=1, keepdims=True)
    assert out2.shape == (B2, 1, C2)
    assert jnp.allclose(out2, ref2, atol=1e-5, rtol=1e-5)

    # --- large enough to take the Pallas path by default (~1.25 MiB) ---
    B3, T3, C3 = 32, 16, 640
    x3 = jax.random.normal(jax.random.PRNGKey(2), (B3, T3, C3), dtype=jnp.float32)
    out3 = jax.block_until_ready(consensus_module(x3, consensus_type="avg", dim=1))
    ref3 = jnp.mean(x3, axis=1, keepdims=True)
    assert out3.shape == (B3, 1, C3)
    assert jnp.allclose(out3, ref3, atol=1e-5, rtol=1e-5)

    # --- bf16 input (exercises dtype-aware sublane alignment + f32 accumulation) ---
    B4, T4, C4 = 16, 8, 128
    x4 = jax.random.normal(jax.random.PRNGKey(3), (B4, T4, C4), dtype=jnp.float32)
    x4b = x4.astype(jnp.bfloat16)
    out4 = jax.block_until_ready(
        consensus_module(x4b, consensus_type="avg", dim=1, min_pallas_bytes=0)
    )
    ref4 = jnp.mean(x4b.astype(jnp.float32), axis=1, keepdims=True).astype(jnp.bfloat16)
    assert out4.shape == (B4, 1, C4)
    assert jnp.allclose(out4.astype(jnp.float32), ref4.astype(jnp.float32),
                        atol=2e-2, rtol=2e-2)

    print("KERNEL_OK")
</pallas_src>

<mosaic_0001>
module attributes {stable_mosaic.version = 11 : i64} {
  func.func @_avg_consensus_kernel(%arg0: i32, %arg1: i32, %arg2: memref<2x8x32xf32, #tpu.memory_space<vmem>>, %arg3: memref<2x32xf32, #tpu.memory_space<vmem>>) attributes {dimension_semantics = [#tpu.dimension_semantics<parallel>, #tpu.dimension_semantics<parallel>], iteration_bounds = array<i64: 1, 1>, scalar_prefetch = 0 : i64, scratch_operands = 0 : i64, tpu.core_type = #tpu.core_type<tc>, window_params = [{transform_indices = @transform_0, window_bounds = array<i64: 2, 8, 32>}, {transform_indices = @transform_1, window_bounds = array<i64: 2, 32>}]} {
    %c0 = arith.constant 0 : index
    %c0_0 = arith.constant 0 : index
    %c0_1 = arith.constant 0 : index
    %0 = vector.load %arg2[%c0, %c0_0, %c0_1] : memref<2x8x32xf32, #tpu.memory_space<vmem>>, vector<2x8x32xf32>
    %cst = arith.constant dense<0.000000e+00> : vector<2x32xf32>
    %1 = vector.multi_reduction <add>, %0, %cst [1] : vector<2x8x32xf32> to vector<2x32xf32>
    %cst_2 = arith.constant 1.250000e-01 : f32
    %2 = vector.broadcast %cst_2 : f32 to vector<2x32xf32>
    %3 = arith.mulf %1, %2 : vector<2x32xf32>
    %c0_3 = arith.constant 0 : index
    %c0_4 = arith.constant 0 : index
    %4 = vector.load %arg3[%c0_3, %c0_4] : memref<2x32xf32, #tpu.memory_space<vmem>>, vector<2x32xf32>
    tpu.vector_store %arg3[%c0_3, %c0_4], %3 {strides = array<i32>} : memref<2x32xf32, #tpu.memory_space<vmem>>, vector<2x32xf32>,
    return
  }
  func.func @transform_0(%arg0: i32, %arg1: i32) -> (i32, i32, i32) {
    %c0_i32 = arith.constant 0 : i32
    %c0_i32_0 = arith.constant 0 : i32
    return %arg0, %c0_i32, %arg1 : i32, i32, i32
  }
  func.func @transform_1(%arg0: i32, %arg1: i32) -> (i32, i32) {
    %c0_i32 = arith.constant 0 : i32
    return %arg0, %arg1 : i32, i32
  }
}

</mosaic_0001>

<bundles_post_ra>
// kernel: tpu_custom_call.1
= control target key start
LH: loop header
LB: loop body
LE: loop exit
PB: predicated region body
PF: predicated region fallthrough
CT: control target
= control target key end

     0   :  { %6 = vsyncpa [#allocation3], 0  ;;  %s144_s0 = inlined_call_operand.hbm [shape: f32[2,8,32], index: 0, kind: input, shape index: {}]   ;;  %s145_s1 = inlined_call_operand.hbm [shape: f32[2,32], index: 1, kind: output, shape index: {}]  }
   0x1   :  { %7 = vsyncpa [#allocation4], 0  ;;  %s12_s8 = sshll.u32 %s144_s0, 4  ;;  %s124_s9 = smov [#allocation2]   ;;  %s13_s8 = int_to_ptr.hbm [resolvable:$true] %s12_s8 }
   0x2   :  { %s14_s10 = sshll.u32 %s124_s9, 4  ;;  %s125_s11 = smov 128   ;;  %s15_s10 = int_to_ptr.vmem [resolvable:$true] %s14_s10 }
   0x3   :  { %s126_s12 = smov 8  }
   0x4   :  { %20 = dma.hbm_to_vmem [thread:$0]  %s13_s8, 256, %s15_s10, [#allocation3], %s125_s11, %s125_s11, %s126_s12  }
   0x5   :  { %120 = dma.done.wait [#allocation3], 256  }
   0x6   :  { %121 = vsyncadd [#allocation3], 4294967040  ;;  %vm27_vm0 = vcmask 261120   ;;  %v25_v0 = vld [vmem:[#allocation2] sm:$0xff]  ;;  %v26_v1 = vld [vmem:[#allocation2 + $0x8] sm:$0xff]  ;;  %s127_s0 = smov [#allocation5]  }
   0x7   :  { %v28_v2 = vsel %vm27_vm0, %v25_v0, 0.0  ;;  %v35_v3 = vsel %vm27_vm0, %v26_v1, 0.0  ;;  %s56_s13 = sshll.u32 %s127_s0, 4  ;;  %s58_s16 = sshll.u32 %s145_s1, 4  ;;  %vm46_vm1 = vcmask 1041409   ;;  %vm49_vm2 = vcmask 254976   ;;  %s57_s13 = int_to_ptr.vmem [resolvable:$true] %s56_s13  ;;  %s59_s16 = int_to_ptr.hbm [resolvable:$true] %s58_s16 }
   0x8   :  { %v29_v4 = vrot.slane %v28_v2, 4  ;;  %v36_v5 = vrot.slane %v35_v3, 4 }
   0xa   :  { %v30_v6 = vadd.f32 %v29_v4, %v28_v2  ;;  %v37_v7 = vadd.f32 %v36_v5, %v35_v3 }
   0xc   :  { %v31_v8 = vrot.slane %v30_v6, 2  ;;  %v38_v9 = vrot.slane %v37_v7, 2 }
   0xe   :  { %v32_v10 = vadd.f32 %v31_v8, %v30_v6  ;;  %v39_v11 = vadd.f32 %v38_v9, %v37_v7 }
  0x10   :  { %v33_v12 = vrot.slane %v32_v10, 1  ;;  %v40_v13 = vrot.slane %v39_v11, 1 }
  0x12   :  { %v34_v14 = vadd.f32 %v33_v12, %v32_v10  ;;  %v41_v15 = vadd.f32 %v40_v13, %v39_v11 }
  0x14   :  { %v42_v16 = vmul.f32 0.125, %v34_v14  ;;  %v43_v17 = vmul.f32 0.125, %v41_v15 }
  0x16   :  { %v47_v18 = vsel %vm46_vm1, %v43_v17, %v42_v16 }
  0x17   :  { %50 = vst.msk [vmem:[#allocation5] sm:$0x3] %vm49_vm2, %v47_v18 }
  0x18   :  { %61 = dma.vmem_to_hbm [thread:$0]  %s57_s13, 32, %s59_s16, [#allocation4]  }
  0x19   :  { %122 = dma.done.wait [#allocation4], 32  }
  0x1a   :  { %123 = vsyncadd [#allocation4], 4294967264 }
  0x1b   :  { %66 = vsyncpa [#allocation3], 1 }
  0x1c   :  { %67 = vsyncpa [#allocation4], 1 }

</bundles_post_ra>
